<compile_context>
chip_gen: v7x
topology: tpu7x:2x2x1
jax: 0.10.0
libtpu: 0.0.40
codegen_flags: <defaults>
</compile_context>

<pallas_src>
import jax
import jax.numpy as jnp
from jax.experimental import pallas as pl
from jax.experimental.pallas import tpu as pltpu


def _soft_ce_kernel_shared(params_ref, img_ref, txtT_ref, row_lse_ref, col_part_ref):
    """Single-exp path (shared scalar stabilizer c >= max |logits|).

    Per row tile: one MXU matmul, ONE exp over the [TQ, N] tile (EUP), one lane
    reduce for the row LSE, and per-sublane column partials accumulated with
    pure vreg adds (no cross-sublane collapse inside the kernel)."""
    scale = params_ref[0]
    c = params_ref[1]

    txt_t = txtT_ref[...]                                        # [D, N] resident
    # Fold logit_scale into the small [TQ, D] image tile (f32 VPU), then cast to
    # the MXU operand dtype (bf16 by default; f32 accumulation below).
    img = (img_ref[...].astype(jnp.float32) * scale).astype(txt_t.dtype)

    # [TQ, N] f32 logits; txt is pre-transposed in the wrapper, so this is a
    # plain (1,),(0,) contraction -> no in-kernel relayout of the resident block.
    logits = jnp.dot(img, txt_t, preferred_element_type=jnp.float32)

    e = jnp.exp(logits - c)                                      # the ONLY exp

    # Per-image (row) log-sum-exp; rows are complete within a tile.
    row_lse_ref[...] = c + jnp.log(jnp.sum(e, axis=-1, keepdims=True))

    # Per-text (column) partial sums, one partial per sublane: [8, N].
    tq, n_cols = e.shape
    col_part_ref[0] = jnp.sum(e.reshape(tq // 8, 8, n_cols), axis=0)


def _soft_ce_kernel_safe(params_ref, img_ref, txtT_ref, row_lse_ref,
                         col_m_ref, col_l_ref):
    """Fallback when the logit spread may exceed the f32 exp range (~70): exact
    per-row max for the row LSE and per-sublane (m, l) partials for the column
    LSE (merged across tiles/sublanes in XLA).  Costs a second exp per tile."""
    scale = params_ref[0]
    txt_t = txtT_ref[...]                                        # [D, N] resident
    img = (img_ref[...].astype(jnp.float32) * scale).astype(txt_t.dtype)
    logits = jnp.dot(img, txt_t, preferred_element_type=jnp.float32)     # [TQ, N]

    m_row = jnp.max(logits, axis=-1, keepdims=True)                      # [TQ, 1]
    row_lse_ref[...] = m_row + jnp.log(
        jnp.sum(jnp.exp(logits - m_row), axis=-1, keepdims=True))

    tq, n_cols = logits.shape
    lg = logits.reshape(tq // 8, 8, n_cols)
    m_sub = jnp.max(lg, axis=0)                                          # [8, N]
    col_m_ref[0] = m_sub
    col_l_ref[0] = jnp.sum(jnp.exp(lg - m_sub[None]), axis=0)            # [8, N]


def _concrete_float(x):
    try:
        return float(x)
    except Exception:          # tracer under jit -> cannot concretize
        return None


def _round_up(x, m):
    return (x + m - 1) // m * m


def soft_contrastive_loss(image_features, text_features, targets, logit_scale,
                          *, row_tile=None, matmul_dtype=jnp.bfloat16,
                          stabilizer="auto"):
    """SoftContrastiveLoss forward (world_size == 1).

    image_features / text_features: [N, D]; targets: [N] int; logit_scale scalar.
    matmul_dtype: MXU operand dtype.  Defaults to bfloat16 (full-rate MXU, half
      the resident VMEM); pass jnp.float32 only if f32 operands are required
      (emulated with multiple bf16 passes, ~3-6x slower matmul).
    stabilizer: "auto" | "shared" | "per_tile".  "shared" uses one scalar
      stabilizer and a single exp per tile; only safe when the logit spread is
      below ~70 (e.g. normalized features and 2*logit_scale < 70).  "auto" picks
      it when that bound can be verified on concrete (non-traced) inputs.
    Returns the scalar f32 loss.
    """
    n, d = image_features.shape
    assert text_features.shape == (n, d)
    assert n % 8 == 0, "batch size must be a multiple of 8"
    if stabilizer not in ("auto", "shared", "per_tile"):
        raise ValueError(f"unknown stabilizer mode: {stabilizer!r}")

    mm_dtype = jnp.dtype(matmul_dtype if matmul_dtype is not None else jnp.float32)
    img32 = image_features.astype(jnp.float32)
    txt32 = text_features.astype(jnp.float32)
    scale = jnp.asarray(logit_scale, jnp.float32).reshape(())

    if row_tile is None:
        # 256 aligns with the v6e/v7x 256x256 MXU M dim and fits the v7x budget;
        # v5e (128 MiB VMEM) can profitably use 512.
        row_tile = min(n, 256)
    assert n % row_tile == 0, "batch size must be divisible by row_tile"
    assert row_tile % 8 == 0, "row_tile must be a multiple of 8"
    if mm_dtype.itemsize < 4:
        assert row_tile == n or row_tile % 16 == 0, \
            "row_tile must be a multiple of 16 for sub-32-bit MXU operands"
    num_tiles = n // row_tile

    # ---- Hoisted target-dependent terms: O(N*D) plain XLA, never in-kernel ----
    #   card_i  = |{j : t_j == t_i}|  (>= 1: the diagonal always matches)
    #   s_row_i = sum_j tmat_ij*logits_ij = scale * img_i . (sum same-class txt_j)
    #   s_col_j = sum_i tmat_ij*logits_ij = scale * txt_j . (sum same-class img_i)
    tgt = jnp.asarray(targets).astype(jnp.int32)
    _, inv = jnp.unique(tgt, return_inverse=True, size=n)
    inv = inv.reshape(n)
    counts = jax.ops.segment_sum(jnp.ones((n,), jnp.float32), inv, num_segments=n)
    card = counts[inv]                                                     # [N]
    cls_txt = jax.ops.segment_sum(txt32, inv, num_segments=n)              # [<=N, D]
    cls_img = jax.ops.segment_sum(img32, inv, num_segments=n)
    s_row = scale * jnp.sum(img32 * cls_txt[inv], axis=-1)                 # [N]
    s_col = scale * jnp.sum(txt32 * cls_img[inv], axis=-1)                 # [N]
    correction = jnp.sum((s_row + s_col) / card)

    # ---- Shared-stabilizer bound: |logits| <= scale * max||img|| * max||txt|| ----
    c_stab = (jnp.abs(scale)
              * jnp.max(jnp.sqrt(jnp.sum(img32 * img32, axis=-1)))
              * jnp.max(jnp.sqrt(jnp.sum(txt32 * txt32, axis=-1)))).astype(jnp.float32)
    if stabilizer == "shared":
        use_shared = True
    elif stabilizer == "per_tile":
        use_shared = False
    else:
        spread = _concrete_float(2.0 * c_stab)
        use_shared = spread is not None and spread < 70.0     # exp stays f32-normal

    # ---- MXU operands: bf16 by default, txt pre-transposed ONCE to [D, N],
    #      feature dim zero-padded to a lane-aligned multiple of 128 ----
    d_pad = max(_round_up(d, 128), 128)
    img_mm = image_features.astype(mm_dtype)
    txt_mm_t = jnp.transpose(text_features).astype(mm_dtype)               # [D, N]
    if d_pad != d:
        img_mm = jnp.pad(img_mm, ((0, 0), (0, d_pad - d)))
        txt_mm_t = jnp.pad(txt_mm_t, ((0, d_pad - d), (0, 0)))
    params = jnp.stack([scale, c_stab])                                     # SMEM scalars

    itemsize = mm_dtype.itemsize
    n_exps = 1 if use_shared else 2
    cost = pl.CostEstimate(
        flops=int(2 * n * n * d_pad + 6 * n * n),
        transcendentals=int(n_exps * n * n + 2 * n),
        bytes_accessed=int(2 * n * d_pad * itemsize + n * 4
                           + num_tiles * 8 * n * 4 * n_exps + 16),
    )

    kernel = _soft_ce_kernel_shared if use_shared else _soft_ce_kernel_safe
    row_shape = jax.ShapeDtypeStruct((n, 1), jnp.float32)
    col_shape = jax.ShapeDtypeStruct((num_tiles, 8, n), jnp.float32)
    out_shape = (row_shape, col_shape) if use_shared else (row_shape, col_shape, col_shape)

    row_spec = pl.BlockSpec((row_tile, 1), lambda t: (t, 0))
    col_spec = lambda: pl.BlockSpec((1, 8, n), lambda t: (t, 0, 0))
    out_specs = ((row_spec, col_spec()) if use_shared
                 else (row_spec, col_spec(), col_spec()))

    def _vmem_limit(single_buffer_resident):
        resident = d_pad * n * itemsize * (1 if single_buffer_resident else 2)
        img_buf = 2 * row_tile * d_pad * itemsize
        out_buf = 2 * (row_tile * 4 + 8 * n * 4 * n_exps)
        temps = 6 * row_tile * n * 4          # logits / exp / ... f32 temporaries
        est = resident + img_buf + out_buf + temps + (1 << 20)
        try:
            cap = int(0.75 * getattr(pltpu.get_tpu_info(),
                                     "vmem_capacity_bytes", 128 << 20))
        except Exception:
            cap = 96 << 20
        return int(min(max(2 * est, min(32 << 20, cap)), cap))

    def _run(single_buffer_resident):
        if single_buffer_resident:
            # The text block's index never changes -> a second pipeline buffer is
            # dead VMEM; single-buffer it (halves the dominant VMEM consumer).
            txt_spec = pl.BlockSpec((d_pad, n), lambda t: (0, 0),
                                    pipeline_mode=pl.Buffered(1))
        else:
            txt_spec = pl.BlockSpec((d_pad, n), lambda t: (0, 0))
        grid_spec = pltpu.PrefetchScalarGridSpec(
            num_scalar_prefetch=0,
            grid=(num_tiles,),
            in_specs=[
                pl.BlockSpec(memory_space=pltpu.SMEM),                  # (scale, c)
                pl.BlockSpec((row_tile, d_pad), lambda t: (t, 0)),      # image row tile
                txt_spec,                                               # resident txt^T
            ],
            out_specs=out_specs,
        )
        return pl.pallas_call(
            kernel,
            out_shape=out_shape,
            grid_spec=grid_spec,
            compiler_params=pltpu.CompilerParams(
                # No cross-iteration carry (per-tile partial outputs), so the row
                # axis is "parallel" -> both v7x TensorCores are used; the tiny
                # cross-tile merge below runs in plain XLA.
                dimension_semantics=("parallel",),
                vmem_limit_bytes=_vmem_limit(single_buffer_resident),
            ),
            cost_estimate=cost,
        )(params, img_mm, txt_mm_t)

    try:
        outs = _run(True)
    except Exception:
        # pipeline_mode=pl.Buffered(1) rejected by this JAX/Mosaic version.
        outs = _run(False)

    if use_shared:
        row_lse, col_part = outs
        lse_col = c_stab + jnp.log(jnp.sum(col_part, axis=(0, 1)))            # [N]
    else:
        row_lse, col_m, col_l = outs
        m = jnp.max(col_m, axis=(0, 1))                                       # [N]
        lse_col = m + jnp.log(
            jnp.sum(col_l * jnp.exp(col_m - m[None, None, :]), axis=(0, 1)))
    sum_lse = jnp.sum(row_lse) + jnp.sum(lse_col)
    # loss = 0.5 * ( mean_i(lse_row_i - s_row_i/card_i) + mean_j(lse_col_j - s_col_j/card_j) )
    return (sum_lse - correction) * (0.5 / n)


def _reference(image_features, text_features, targets, logit_scale):
    logits = logit_scale * jnp.matmul(image_features, text_features.T,
                                      precision=jax.lax.Precision.HIGHEST)
    tmat = (targets[:, None] == targets[None, :]).astype(jnp.float32)
    card = jnp.sum(tmat, axis=1)

    def soft_ce(lg):
        ls = jax.nn.log_softmax(lg, axis=-1)
        return jnp.mean(jnp.sum(-tmat * ls, axis=-1) / card)

    return (soft_ce(logits) + soft_ce(logits.T)) / 2.0


if __name__ == "__main__":
    key = jax.random.PRNGKey(0)
    k1, k2, k3, k4, k5, k6 = jax.random.split(key, 6)
    scale = jnp.float32(14.285715)  # ~exp(learnable temperature), deterministic

    # --- test A: tiny batch, single tile, unnormalized -> per-tile-max path, f32 MXU.
    N1, D1 = 8, 32
    img1 = jax.random.normal(k1, (N1, D1), dtype=jnp.float32)
    txt1 = jax.random.normal(k2, (N1, D1), dtype=jnp.float32)
    tgt1 = jax.random.randint(k3, (N1,), 0, 4, dtype=jnp.int32)
    loss1 = jax.block_until_ready(
        soft_contrastive_loss(img1, txt1, tgt1, scale, matmul_dtype=jnp.float32))
    ref1 = _reference(img1, txt1, tgt1, scale)
    assert jnp.allclose(loss1, ref1, rtol=1e-4, atol=1e-2), (loss1, ref1)

    # --- test B: normalized features -> shared-stabilizer single-exp path, multi-tile, f32.
    N2, D2, TQ = 128, 64, 64
    img2 = jax.random.normal(k4, (N2, D2), dtype=jnp.float32)
    txt2 = jax.random.normal(k5, (N2, D2), dtype=jnp.float32)
    tgt2 = jax.random.randint(k6, (N2,), 0, 8, dtype=jnp.int32)
    img2n = img2 / jnp.linalg.norm(img2, axis=-1, keepdims=True)
    txt2n = txt2 / jnp.linalg.norm(txt2, axis=-1, keepdims=True)
    loss2 = jax.block_until_ready(
        soft_contrastive_loss(img2n, txt2n, tgt2, scale, row_tile=TQ,
                              matmul_dtype=jnp.float32))
    ref2 = _reference(img2n, txt2n, tgt2, scale)
    assert jnp.allclose(loss2, ref2, rtol=1e-4, atol=1e-3), (loss2, ref2)

    # --- test C: unnormalized + default bf16 MXU operands (safe path), multi-tile.
    loss3 = jax.block_until_ready(
        soft_contrastive_loss(img2, txt2, tgt2, scale, row_tile=TQ))
    ref3 = _reference(img2, txt2, tgt2, scale)
    assert jnp.isfinite(loss3)
    assert abs(float(loss3) - float(ref3)) <= 0.05 * abs(float(ref3)) + 1.0, (loss3, ref3)

    # --- test D: normalized + default bf16 (shared-stabilizer path with bf16 operands).
    loss4 = jax.block_until_ready(
        soft_contrastive_loss(img2n, txt2n, tgt2, scale, row_tile=TQ))
    assert jnp.isfinite(loss4)
    assert abs(float(loss4) - float(ref2)) <= 0.05 * abs(float(ref2)) + 0.3, (loss4, ref2)

    print("KERNEL_OK")
</pallas_src>

<mosaic_0001>
module attributes {stable_mosaic.version = 11 : i64} {
  func.func @_soft_ce_kernel_safe(%arg0: i32, %arg1: memref<2xf32, #tpu.memory_space<smem>>, %arg2: memref<8x128xf32, #tpu.memory_space<vmem>>, %arg3: memref<128x8xf32, #tpu.memory_space<vmem>>, %arg4: memref<8x1xf32, #tpu.memory_space<vmem>>, %arg5: memref<1x8x8xf32, #tpu.memory_space<vmem>>, %arg6: memref<1x8x8xf32, #tpu.memory_space<vmem>>) attributes {dimension_semantics = [#tpu.dimension_semantics<parallel>], iteration_bounds = array<i64: 1>, scalar_prefetch = 0 : i64, scratch_operands = 0 : i64, tpu.core_type = #tpu.core_type<tc>, window_params = [{transform_indices = @transform_0, window_bounds = array<i64: 2>}, {transform_indices = @transform_1, window_bounds = array<i64: 8, 128>}, {pipeline_mode = #tpu.pipeline_mode<synchronous>, transform_indices = @transform_2, window_bounds = array<i64: 128, 8>}, {transform_indices = @transform_3, window_bounds = array<i64: 8, 1>}, {transform_indices = @transform_4, window_bounds = array<i64: 1, 8, 8>}, {transform_indices = @transform_5, window_bounds = array<i64: 1, 8, 8>}]} {
    %c0 = arith.constant 0 : index
    %0 = memref.load %arg1[%c0] : memref<2xf32, #tpu.memory_space<smem>>
    %c0_0 = arith.constant 0 : index
    %c0_1 = arith.constant 0 : index
    %1 = vector.load %arg3[%c0_0, %c0_1] : memref<128x8xf32, #tpu.memory_space<vmem>>, vector<128x8xf32>
    %c0_2 = arith.constant 0 : index
    %c0_3 = arith.constant 0 : index
    %2 = vector.load %arg2[%c0_2, %c0_3] : memref<8x128xf32, #tpu.memory_space<vmem>>, vector<8x128xf32>
    %3 = vector.broadcast %0 : f32 to vector<8x128xf32>
    %4 = arith.mulf %2, %3 : vector<8x128xf32>
    %cst = arith.constant dense<0.000000e+00> : vector<8x8xf32>
    %5 = tpu.matmul %4, %1, %cst {dimension_numbers = #tpu.dot_dimension_numbers<[1], [0], [0], [1], [0, 0, 1, 1], [], []>} : vector<8x128xf32>, vector<128x8xf32>, vector<8x8xf32> -> vector<8x8xf32>
    %cst_4 = arith.constant dense<0xFF800000> : vector<8xf32>
    %6 = vector.multi_reduction <maximumf>, %5, %cst_4 [1] : vector<8x8xf32> to vector<8xf32>
    %7 = vector.shape_cast %6 : vector<8xf32> to vector<8x1xf32>
    %8 = vector.broadcast %7 : vector<8x1xf32> to vector<8x8xf32>
    %9 = arith.subf %5, %8 : vector<8x8xf32>
    %10 = math.exp %9 : vector<8x8xf32>
    %cst_5 = arith.constant dense<0.000000e+00> : vector<8xf32>
    %11 = vector.multi_reduction <add>, %10, %cst_5 [1] : vector<8x8xf32> to vector<8xf32>
    %12 = vector.shape_cast %11 : vector<8xf32> to vector<8x1xf32>
    %13 = math.log %12 : vector<8x1xf32>
    %14 = arith.addf %7, %13 : vector<8x1xf32>
    %c0_6 = arith.constant 0 : index
    %c0_7 = arith.constant 0 : index
    %15 = vector.load %arg4[%c0_6, %c0_7] : memref<8x1xf32, #tpu.memory_space<vmem>>, vector<8x1xf32>
    tpu.vector_store %arg4[%c0_6, %c0_7], %14 {strides = array<i32>} : memref<8x1xf32, #tpu.memory_space<vmem>>, vector<8x1xf32>,
    %16 = vector.shape_cast %5 : vector<8x8xf32> to vector<1x8x8xf32>
    %cst_8 = arith.constant dense<0xFF800000> : vector<8x8xf32>
    %17 = vector.multi_reduction <maximumf>, %16, %cst_8 [0] : vector<1x8x8xf32> to vector<8x8xf32>
    %c0_9 = arith.constant 0 : index
    %c0_10 = arith.constant 0 : index
    %c0_11 = arith.constant 0 : index
    %18 = vector.load %arg5[%c0_9, %c0_10, %c0_11] : memref<1x8x8xf32, #tpu.memory_space<vmem>>, vector<1x8x8xf32>
    %19 = vector.shape_cast %18 : vector<1x8x8xf32> to vector<8x8xf32>
    %20 = vector.shape_cast %17 : vector<8x8xf32> to vector<1x8x8xf32>
    tpu.vector_store %arg5[%c0_9, %c0_10, %c0_11], %20 {strides = array<i32>} : memref<1x8x8xf32, #tpu.memory_space<vmem>>, vector<1x8x8xf32>,
    %21 = vector.shape_cast %17 : vector<8x8xf32> to vector<1x8x8xf32>
    %22 = arith.subf %16, %21 : vector<1x8x8xf32>
    %23 = math.exp %22 : vector<1x8x8xf32>
    %cst_12 = arith.constant dense<0.000000e+00> : vector<8x8xf32>
    %24 = vector.multi_reduction <add>, %23, %cst_12 [0] : vector<1x8x8xf32> to vector<8x8xf32>
    %c0_13 = arith.constant 0 : index
    %c0_14 = arith.constant 0 : index
    %c0_15 = arith.constant 0 : index
    %25 = vector.load %arg6[%c0_13, %c0_14, %c0_15] : memref<1x8x8xf32, #tpu.memory_space<vmem>>, vector<1x8x8xf32>
    %26 = vector.shape_cast %25 : vector<1x8x8xf32> to vector<8x8xf32>
    %27 = vector.shape_cast %24 : vector<8x8xf32> to vector<1x8x8xf32>
    tpu.vector_store %arg6[%c0_13, %c0_14, %c0_15], %27 {strides = array<i32>} : memref<1x8x8xf32, #tpu.memory_space<vmem>>, vector<1x8x8xf32>,
    return
  }
  func.func @transform_0(%arg0: i32) -> i32 {
    %c0_i32 = arith.constant 0 : i32
    %c0_i32_0 = arith.constant 0 : i32
    return %c0_i32 : i32
  }
  func.func @transform_1(%arg0: i32) -> (i32, i32) {
    %c0_i32 = arith.constant 0 : i32
    %c0_i32_0 = arith.constant 0 : i32
    return %arg0, %c0_i32 : i32, i32
  }
  func.func @transform_2(%arg0: i32) -> (i32, i32) {
    %c0_i32 = arith.constant 0 : i32
    %c0_i32_0 = arith.constant 0 : i32
    %c0_i32_1 = arith.constant 0 : i32
    return %c0_i32, %c0_i32_0 : i32, i32
  }
  func.func @transform_3(%arg0: i32) -> (i32, i32) {
    %c0_i32 = arith.constant 0 : i32
    %c0_i32_0 = arith.constant 0 : i32
    return %arg0, %c0_i32 : i32, i32
  }
  func.func @transform_4(%arg0: i32) -> (i32, i32, i32) {
    %c0_i32 = arith.constant 0 : i32
    %c0_i32_0 = arith.constant 0 : i32
    %c0_i32_1 = arith.constant 0 : i32
    return %arg0, %c0_i32, %c0_i32_0 : i32, i32, i32
  }
  func.func @transform_5(%arg0: i32) -> (i32, i32, i32) {
    %c0_i32 = arith.constant 0 : i32
    %c0_i32_0 = arith.constant 0 : i32
    %c0_i32_1 = arith.constant 0 : i32
    return %arg0, %c0_i32, %c0_i32_0 : i32, i32, i32
  }
}

module attributes {stable_mosaic.version = 11 : i64} {
  func.func @_soft_ce_kernel_safe(%arg0: i32, %arg1: memref<2xf32, #tpu.memory_space<smem>>, %arg2: memref<8x128xf32, #tpu.memory_space<vmem>>, %arg3: memref<128x8xf32, #tpu.memory_space<vmem>>, %arg4: memref<8x1xf32, #tpu.memory_space<vmem>>, %arg5: memref<1x8x8xf32, #tpu.memory_space<vmem>>, %arg6: memref<1x8x8xf32, #tpu.memory_space<vmem>>) attributes {dimension_semantics = [#tpu.dimension_semantics<parallel>], iteration_bounds = array<i64: 1>, scalar_prefetch = 0 : i64, scratch_operands = 0 : i64, tpu.core_type = #tpu.core_type<tc>, window_params = [{transform_indices = @transform_0, window_bounds = array<i64: 2>}, {transform_indices = @transform_1, window_bounds = array<i64: 8, 128>}, {pipeline_mode = #tpu.pipeline_mode<synchronous>, transform_indices = @transform_2, window_bounds = array<i64: 128, 8>}, {transform_indices = @transform_3, window_bounds = array<i64: 8, 1>}, {transform_indices = @transform_4, window_bounds = array<i64: 1, 8, 8>}, {transform_indices = @transform_5, window_bounds = array<i64: 1, 8, 8>}]} {
    %c0 = arith.constant 0 : index
    %0 = memref.load %arg1[%c0] : memref<2xf32, #tpu.memory_space<smem>>
    %c0_0 = arith.constant 0 : index
    %c0_1 = arith.constant 0 : index
    %1 = vector.load %arg3[%c0_0, %c0_1] : memref<128x8xf32, #tpu.memory_space<vmem>>, vector<128x8xf32>
    %c0_2 = arith.constant 0 : index
    %c0_3 = arith.constant 0 : index
    %2 = vector.load %arg2[%c0_2, %c0_3] : memref<8x128xf32, #tpu.memory_space<vmem>>, vector<8x128xf32>
    %3 = vector.broadcast %0 : f32 to vector<8x128xf32>
    %4 = arith.mulf %2, %3 : vector<8x128xf32>
    %cst = arith.constant dense<0.000000e+00> : vector<8x8xf32>
    %5 = tpu.matmul %4, %1, %cst {dimension_numbers = #tpu.dot_dimension_numbers<[1], [0], [0], [1], [0, 0, 1, 1], [], []>} : vector<8x128xf32>, vector<128x8xf32>, vector<8x8xf32> -> vector<8x8xf32>
    %cst_4 = arith.constant dense<0xFF800000> : vector<8xf32>
    %6 = vector.multi_reduction <maximumf>, %5, %cst_4 [1] : vector<8x8xf32> to vector<8xf32>
    %7 = vector.shape_cast %6 : vector<8xf32> to vector<8x1xf32>
    %8 = vector.broadcast %7 : vector<8x1xf32> to vector<8x8xf32>
    %9 = arith.subf %5, %8 : vector<8x8xf32>
    %10 = math.exp %9 : vector<8x8xf32>
    %cst_5 = arith.constant dense<0.000000e+00> : vector<8xf32>
    %11 = vector.multi_reduction <add>, %10, %cst_5 [1] : vector<8x8xf32> to vector<8xf32>
    %12 = vector.shape_cast %11 : vector<8xf32> to vector<8x1xf32>
    %13 = math.log %12 : vector<8x1xf32>
    %14 = arith.addf %7, %13 : vector<8x1xf32>
    %c0_6 = arith.constant 0 : index
    %c0_7 = arith.constant 0 : index
    %15 = vector.load %arg4[%c0_6, %c0_7] : memref<8x1xf32, #tpu.memory_space<vmem>>, vector<8x1xf32>
    tpu.vector_store %arg4[%c0_6, %c0_7], %14 {strides = array<i32>} : memref<8x1xf32, #tpu.memory_space<vmem>>, vector<8x1xf32>,
    %16 = vector.shape_cast %5 : vector<8x8xf32> to vector<1x8x8xf32>
    %cst_8 = arith.constant dense<0xFF800000> : vector<8x8xf32>
    %17 = vector.multi_reduction <maximumf>, %16, %cst_8 [0] : vector<1x8x8xf32> to vector<8x8xf32>
    %c0_9 = arith.constant 0 : index
    %c0_10 = arith.constant 0 : index
    %c0_11 = arith.constant 0 : index
    %18 = vector.load %arg5[%c0_9, %c0_10, %c0_11] : memref<1x8x8xf32, #tpu.memory_space<vmem>>, vector<1x8x8xf32>
    %19 = vector.shape_cast %18 : vector<1x8x8xf32> to vector<8x8xf32>
    %20 = vector.shape_cast %17 : vector<8x8xf32> to vector<1x8x8xf32>
    tpu.vector_store %arg5[%c0_9, %c0_10, %c0_11], %20 {strides = array<i32>} : memref<1x8x8xf32, #tpu.memory_space<vmem>>, vector<1x8x8xf32>,
    %21 = vector.shape_cast %17 : vector<8x8xf32> to vector<1x8x8xf32>
    %22 = arith.subf %16, %21 : vector<1x8x8xf32>
    %23 = math.exp %22 : vector<1x8x8xf32>
    %cst_12 = arith.constant dense<0.000000e+00> : vector<8x8xf32>
    %24 = vector.multi_reduction <add>, %23, %cst_12 [0] : vector<1x8x8xf32> to vector<8x8xf32>
    %c0_13 = arith.constant 0 : index
    %c0_14 = arith.constant 0 : index
    %c0_15 = arith.constant 0 : index
    %25 = vector.load %arg6[%c0_13, %c0_14, %c0_15] : memref<1x8x8xf32, #tpu.memory_space<vmem>>, vector<1x8x8xf32>
    %26 = vector.shape_cast %25 : vector<1x8x8xf32> to vector<8x8xf32>
    %27 = vector.shape_cast %24 : vector<8x8xf32> to vector<1x8x8xf32>
    tpu.vector_store %arg6[%c0_13, %c0_14, %c0_15], %27 {strides = array<i32>} : memref<1x8x8xf32, #tpu.memory_space<vmem>>, vector<1x8x8xf32>,
    return
  }
  func.func @transform_0(%arg0: i32) -> i32 {
    %c0_i32 = arith.constant 0 : i32
    %c0_i32_0 = arith.constant 0 : i32
    return %c0_i32 : i32
  }
  func.func @transform_1(%arg0: i32) -> (i32, i32) {
    %c0_i32 = arith.constant 0 : i32
    %c0_i32_0 = arith.constant 0 : i32
    return %arg0, %c0_i32 : i32, i32
  }
  func.func @transform_2(%arg0: i32) -> (i32, i32) {
    %c0_i32 = arith.constant 0 : i32
    %c0_i32_0 = arith.constant 0 : i32
    %c0_i32_1 = arith.constant 0 : i32
    return %c0_i32, %c0_i32_0 : i32, i32
  }
  func.func @transform_3(%arg0: i32) -> (i32, i32) {
    %c0_i32 = arith.constant 0 : i32
    %c0_i32_0 = arith.constant 0 : i32
    return %arg0, %c0_i32 : i32, i32
  }
  func.func @transform_4(%arg0: i32) -> (i32, i32, i32) {
    %c0_i32 = arith.constant 0 : i32
    %c0_i32_0 = arith.constant 0 : i32
    %c0_i32_1 = arith.constant 0 : i32
    return %arg0, %c0_i32, %c0_i32_0 : i32, i32, i32
  }
  func.func @transform_5(%arg0: i32) -> (i32, i32, i32) {
    %c0_i32 = arith.constant 0 : i32
    %c0_i32_0 = arith.constant 0 : i32
    %c0_i32_1 = arith.constant 0 : i32
    return %arg0, %c0_i32, %c0_i32_0 : i32, i32, i32
  }
}

</mosaic_0001>

<bundles_post_ra>
// kernel: tpu_custom_call.1
= control target key start
LH: loop header
LB: loop body
LE: loop exit
PB: predicated region body
PF: predicated region fallthrough
CT: control target
= control target key end

     0   :  { %11 = vsyncpa [#allocation4], 0  ;;  %s447_s0 = inlined_call_operand.vmem [shape: f32[2], index: 0, kind: input, shape index: {}]   ;;  %s448_s1 = inlined_call_operand.vmem [shape: f32[8,128], index: 1, kind: input, shape index: {}]   ;;  %s449_s2 = inlined_call_operand.vmem [shape: f32[128,8], index: 2, kind: input, shape index: {}]   ;;  %s450_s3 = inlined_call_operand.vmem [shape: f32[8,1], index: 3, kind: output, shape index: {0}]   ;;  %s451_s4 = inlined_call_operand.hbm [shape: f32[1,8,8], index: 4, kind: output, shape index: {1}]   ;;  %s452_s5 = inlined_call_operand.hbm [shape: f32[1,8,8], index: 5, kind: output, shape index: {2}]  }
   0x1   :  { %12 = vsyncpa [#allocation3], 0 }
   0x2   :  { %13 = vsyncpa [#allocation7], 0  ;;  %s20_s20 = sshll.u32 %s447_s0, 4  ;;  %s21_s20 = int_to_ptr.vmem [resolvable:$true] %s20_s20 }
   0x3   :  { %s264_s21 = scalar_lea.vmem %s21_s20, 16  ;;  %p269_p1 = scmp.lt.s32.totalorder %s21_s20, %s21_s20 }
   0x4   :  { %p265_p0 = scmp.ne.s32.totalorder %s21_s20, %s264_s21  ;;  %p270_p2 = scmp.lt.s32.totalorder %s264_s21, %s264_s21 }
   0x6   :  { %p271_p3 = por %p270_p2, %p269_p1 }
   0x8   :  { %p272_p4 = pnand %p271_p3, %p265_p0 }
   0xa   :  { %275 = shalt.err (!%p272_p4)
}
   0xb   :  { %s326_s22 = smov [#allocation2]  }
   0xc   :  { %23 = dma.vmem_to_smem %s21_s20, 16, %s326_s22, [#allocation4]  }
   0xd   :  { %320 = dma.done.wait [#allocation4], 16  }
   0xe   :  { %321 = vsyncadd [#allocation4], 4294967280 }
   0xf   :  { %31 = sfence }
  0x10   :  { %v33_v0 = vld [vmem:[%s449_s2] sm:$0xff]  ;;  %v34_v1 = vld [vmem:[%s449_s2 + $0x8] sm:$0xff]  ;;  %v35_v2 = vld [vmem:[%s449_s2 + $0x10] sm:$0xff]  ;;  %v327_v3 = vmov 0.0|0.0   ;;  %vm328_vm0 = vmmov 0   ;;  %v329_v6 = vmov 0.0  }
  0x11   :  { %228 = vmatprep.subr.bf16.mxu0 %v327_v3  ;;  %v229_v4 = vpack.c.bf16 %v34_v1, %v33_v0  ;;  %v36_v5 = vld [vmem:[%s449_s2 + $0x18] sm:$0xff]  ;;  %225 = vmatprep.mubr.msk.f32.mxu0 %vm328_vm0, %v329_v6  ;;  %v37_v8 = vld [vmem:[%s449_s2 + $0x20] sm:$0xff]  ;;  %v38_v9 = vld [vmem:[%s449_s2 + $0x28] sm:$0xff]  ;;  %s32_s21 = sld [smem:[#allocation2]]  ;;  %vm122_vm1 = vcmask 64512   ;;  %s331_s6 = smov [#allocation6]  }
  0x12   :  { %v232_v7 = vpack.c.bf16 %v36_v5, %v35_v2  ;;  %v235_v10 = vpack.c.bf16 %v38_v9, %v37_v8  ;;  %v39_v11 = vld [vmem:[%s449_s2 + $0x30] sm:$0xff]  ;;  %v40_v12 = vld [vmem:[%s449_s2 + $0x38] sm:$0xff]  ;;  %v41_v14 = vld [vmem:[%s449_s2 + $0x40] sm:$0xff]  ;;  %s161_s7 = sshll.u32 %s331_s6, 4  ;;  %s162_s7 = int_to_ptr.vmem [resolvable:$true] %s161_s7 }
  0x13   :  { %230 = vmatpush3.bf16.msra.mxu0 %v229_v4  ;;  %v238_v13 = vpack.c.bf16 %v40_v12, %v39_v11  ;;  %v42_v15 = vld [vmem:[%s449_s2 + $0x48] sm:$0xff]  ;;  %v43_v17 = vld [vmem:[%s449_s2 + $0x50] sm:$0xff]  ;;  %v44_v18 = vld [vmem:[%s449_s2 + $0x58] sm:$0xff] }
  0x14   :  { %231 = vmatprep.subr.bf16.mxu0 %v327_v3  ;;  %v241_v16 = vpack.c.bf16 %v42_v15, %v41_v14  ;;  %v244_v19 = vpack.c.bf16 %v44_v18, %v43_v17  ;;  %v45_v20 = vld [vmem:[%s449_s2 + $0x60] sm:$0xff]  ;;  %v46_v21 = vld [vmem:[%s449_s2 + $0x68] sm:$0xff]  ;;  %v47_v23 = vld [vmem:[%s449_s2 + $0x70] sm:$0xff] }
  0x15   :  { %v247_v22 = vpack.c.bf16 %v46_v21, %v45_v20  ;;  %v48_v24 = vld [vmem:[%s449_s2 + $0x78] sm:$0xff]  ;;  %v49_v26 = vld [vmem:[%s448_s1] sm:$0xff]  ;;  %s330_s1 = smov [#allocation5]  }
  0x16   :  { %v250_v25 = vpack.c.bf16 %v48_v24, %v47_v23  ;;  %s151_s2 = sshll.u32 %s330_s1, 4  ;;  %s152_s2 = int_to_ptr.vmem [resolvable:$true] %s151_s2 }
  0x17   :  { %233 = vmatpush3.bf16.msra.mxu0 %v232_v7  ;;  %v50_v27 = vstv %s32_s21  ;;  %s276_s8 = scalar_lea.vmem %s152_s2, 128  ;;  %p281_p6 = scmp.lt.s32.totalorder %s152_s2, %s152_s2 }
  0x18   :  { %234 = vmatprep.subr.bf16.mxu0 %v327_v3  ;;  %v51_v28 = vmul.f32 %v50_v27, %v49_v26  ;;  %p277_p5 = scmp.ne.s32.totalorder %s152_s2, %s276_s8  ;;  %p282_p7 = scmp.lt.s32.totalorder %s276_s8, %s276_s8 }
  0x1a   :  { %p283_p8 = por %p282_p7, %p281_p6 }
  0x1b   :  { %236 = vmatpush3.bf16.msra.mxu0 %v235_v10 }
  0x1c   :  { %237 = vmatprep.subr.bf16.mxu0 %v327_v3  ;;  %p284_p9 = pnand %p283_p8, %p277_p5 }
  0x1f   :  { %239 = vmatpush3.bf16.msra.mxu0 %v238_v13 }
  0x20   :  { %240 = vmatprep.subr.bf16.mxu0 %v327_v3 }
  0x23   :  { %242 = vmatpush3.bf16.msra.mxu0 %v241_v16 }
  0x24   :  { %243 = vmatprep.subr.bf16.mxu0 %v327_v3 }
  0x27   :  { %245 = vmatpush3.bf16.msra.mxu0 %v244_v19 }
  0x28   :  { %246 = vmatprep.subr.bf16.mxu0 %v327_v3 }
  0x2b   :  { %248 = vmatpush3.bf16.msra.mxu0 %v247_v22 }
  0x2c   :  { %249 = vmatprep.subr.bf16.mxu0 %v327_v3 }
  0x2f   :  { %251 = vmatpush3.bf16.msra.mxu0 %v250_v25 }
  0x32   :  { %226 = vmatmul.mubr.f32.vlgmr.msra.gmra.mrb[0].mxu0 %v51_v28 }
 0x105   :  { %v118_v29 = vpop.f32.mrb[0].mxu0 }
 0x106   :  { %v138_v30 = vsub.f32 %v118_v29, %v118_v29  ;;  %v227_v31 = vpop.f32.mrb[1].mxu0  ;;  %v123_v32 = vsel %vm122_vm1, %v118_v29, -inf  ;;  %137 = vst.msk [vmem:[#allocation5] sm:$0xff] %vm122_vm1, %v118_v29 }
 0x107   :  { %124 = vmax.xlane.f32.xlu0 %v123_v32 }
 0x108   :  { %v139_v33 = vmul.f32 1.442695, %v138_v30 }
 0x10a   :  { %258 = vpow2.f32 %v139_v33 }
 0x114   :  { %v259_v34 = vpop.eup %258 }
 0x115   :  { %142 = vst.msk [vmem:[#allocation6] sm:$0xff] %vm122_vm1, %v259_v34 }
 0x194   :  { %v125_v35 = vpop.xlane.xlu0 %124 }
 0x195   :  { %v126_v36 = vsub.f32 %v118_v29, %v125_v35 }
 0x197   :  { %v127_v37 = vmul.f32 1.442695, %v126_v36 }
 0x199   :  { %260 = vpow2.f32 %v127_v37 }
 0x1a3   :  { %v261_v38 = vpop.eup %260 }
 0x1a4   :  { %v129_v39 = vsel %vm122_vm1, %v261_v38, 0.0 }
 0x1a5   :  { %130 = vadd.xlane.f32.xlu0 %v129_v39 }
 0x1a6   :  { %287 = shalt.err (!%p284_p9)
}
 0x1a7   :  { %s288_s11 = scalar_lea.hbm %s451_s4, 128 }
 0x1a8   :  { %p289_p10 = scmp.ne.s32.totalorder %s451_s4, %s288_s11  ;;  %p292_p11 = scmp.lt.u32.totalorder %s288_s11, %s451_s4 }
 0x1aa   :  { %p294_p12 = pnand %p292_p11, %p289_p10 }
 0x1ac   :  { %297 = shalt.err (!%p294_p12)
}
 0x1ad   :  { %154 = dma.vmem_to_hbm [thread:$0]  %s152_s2, 128, %s451_s4, [#allocation3]  }
 0x1ae   :  { %s298_s18 = scalar_lea.vmem %s162_s7, 128  ;;  %p303_p0 = scmp.lt.s32.totalorder %s162_s7, %s162_s7 }
 0x1af   :  { %p299_p13 = scmp.ne.s32.totalorder %s162_s7, %s298_s18  ;;  %p304_p1 = scmp.lt.s32.totalorder %s298_s18, %s298_s18 }
 0x1b1   :  { %p305_p2 = por %p304_p1, %p303_p0 }
 0x1b3   :  { %p306_p3 = pnand %p305_p2, %p299_p13 }
 0x1b5   :  { %309 = shalt.err (!%p306_p3)
}
 0x1b6   :  { %s310_s21 = scalar_lea.hbm %s452_s5, 128 }
 0x1b7   :  { %p311_p4 = scmp.ne.s32.totalorder %s452_s5, %s310_s21  ;;  %p314_p5 = scmp.lt.u32.totalorder %s310_s21, %s452_s5 }
 0x1b9   :  { %p316_p6 = pnand %p314_p5, %p311_p4 }
 0x1bb   :  { %319 = shalt.err (!%p316_p6)
}
 0x1bc   :  { %164 = dma.vmem_to_hbm [thread:$0]  %s162_s7, 128, %s452_s5, [#allocation7]   ;;  %vm135_vm2 = vcmask 7168  }
 0x232   :  { %v131_v40 = vpop.xlane.xlu0 %130 }
 0x233   :  { %262 = vlog2.f32 %v131_v40 }
 0x23d   :  { %v263_v41 = vpop.eup %262 }
 0x23e   :  { %v133_v42 = vmul.f32 0.6931472, %v263_v41 }
 0x240   :  { %v134_v43 = vadd.f32 %v133_v42, %v125_v35 }
 0x242   :  { %136 = vst.msk [vmem:[%s450_s3] sm:$0xff] %vm135_vm2, %v134_v43 }
 0x243   :  { %322 = dma.done.wait [#allocation3], 128  }
 0x244   :  { %323 = vsyncadd [#allocation3], 4294967168 }
 0x245   :  { %324 = dma.done.wait [#allocation7], 128  }
 0x246   :  { %325 = vsyncadd [#allocation7], 4294967168 }
 0x247   :  { %173 = vsyncpa [#allocation3], 1 }
 0x248   :  { %174 = vsyncpa [#allocation7], 1 }
 0x249   :  { %175 = vsyncpa [#allocation4], 1 }

// kernel: tpu_custom_call.1
= control target key start
LH: loop header
LB: loop body
LE: loop exit
PB: predicated region body
PF: predicated region fallthrough
CT: control target
= control target key end

     0   :  { %11 = vsyncpa [#allocation4], 0  ;;  %s447_s0 = inlined_call_operand.vmem [shape: f32[2], index: 0, kind: input, shape index: {}]   ;;  %s448_s1 = inlined_call_operand.vmem [shape: f32[8,128], index: 1, kind: input, shape index: {}]   ;;  %s449_s2 = inlined_call_operand.vmem [shape: f32[128,8], index: 2, kind: input, shape index: {}]   ;;  %s450_s3 = inlined_call_operand.vmem [shape: f32[8,1], index: 3, kind: output, shape index: {0}]   ;;  %s451_s4 = inlined_call_operand.hbm [shape: f32[1,8,8], index: 4, kind: output, shape index: {1}]   ;;  %s452_s5 = inlined_call_operand.hbm [shape: f32[1,8,8], index: 5, kind: output, shape index: {2}]  }
   0x1   :  { %12 = vsyncpa [#allocation3], 0 }
   0x2   :  { %13 = vsyncpa [#allocation7], 0  ;;  %s20_s20 = sshll.u32 %s447_s0, 4  ;;  %s21_s20 = int_to_ptr.vmem [resolvable:$true] %s20_s20 }
   0x3   :  { %s264_s21 = scalar_lea.vmem %s21_s20, 16  ;;  %p269_p1 = scmp.lt.s32.totalorder %s21_s20, %s21_s20 }
   0x4   :  { %p265_p0 = scmp.ne.s32.totalorder %s21_s20, %s264_s21  ;;  %p270_p2 = scmp.lt.s32.totalorder %s264_s21, %s264_s21 }
   0x6   :  { %p271_p3 = por %p270_p2, %p269_p1 }
   0x8   :  { %p272_p4 = pnand %p271_p3, %p265_p0 }
   0xa   :  { %275 = shalt.err (!%p272_p4)
}
   0xb   :  { %s326_s22 = smov [#allocation2]  }
   0xc   :  { %23 = dma.vmem_to_smem %s21_s20, 16, %s326_s22, [#allocation4]  }
   0xd   :  { %320 = dma.done.wait [#allocation4], 16  }
   0xe   :  { %321 = vsyncadd [#allocation4], 4294967280 }
   0xf   :  { %31 = sfence }
  0x10   :  { %v33_v0 = vld [vmem:[%s449_s2] sm:$0xff]  ;;  %v34_v1 = vld [vmem:[%s449_s2 + $0x8] sm:$0xff]  ;;  %v35_v2 = vld [vmem:[%s449_s2 + $0x10] sm:$0xff]  ;;  %v327_v3 = vmov 0.0|0.0   ;;  %vm328_vm0 = vmmov 0   ;;  %v329_v6 = vmov 0.0  }
  0x11   :  { %228 = vmatprep.subr.bf16.mxu0 %v327_v3  ;;  %v229_v4 = vpack.c.bf16 %v34_v1, %v33_v0  ;;  %v36_v5 = vld [vmem:[%s449_s2 + $0x18] sm:$0xff]  ;;  %225 = vmatprep.mubr.msk.f32.mxu0 %vm328_vm0, %v329_v6  ;;  %v37_v8 = vld [vmem:[%s449_s2 + $0x20] sm:$0xff]  ;;  %v38_v9 = vld [vmem:[%s449_s2 + $0x28] sm:$0xff]  ;;  %s32_s21 = sld [smem:[#allocation2]]  ;;  %vm122_vm1 = vcmask 64512   ;;  %s331_s6 = smov [#allocation6]  }
  0x12   :  { %v232_v7 = vpack.c.bf16 %v36_v5, %v35_v2  ;;  %v235_v10 = vpack.c.bf16 %v38_v9, %v37_v8  ;;  %v39_v11 = vld [vmem:[%s449_s2 + $0x30] sm:$0xff]  ;;  %v40_v12 = vld [vmem:[%s449_s2 + $0x38] sm:$0xff]  ;;  %v41_v14 = vld [vmem:[%s449_s2 + $0x40] sm:$0xff]  ;;  %s161_s7 = sshll.u32 %s331_s6, 4  ;;  %s162_s7 = int_to_ptr.vmem [resolvable:$true] %s161_s7 }
  0x13   :  { %230 = vmatpush3.bf16.msra.mxu0 %v229_v4  ;;  %v238_v13 = vpack.c.bf16 %v40_v12, %v39_v11  ;;  %v42_v15 = vld [vmem:[%s449_s2 + $0x48] sm:$0xff]  ;;  %v43_v17 = vld [vmem:[%s449_s2 + $0x50] sm:$0xff]  ;;  %v44_v18 = vld [vmem:[%s449_s2 + $0x58] sm:$0xff] }
  0x14   :  { %231 = vmatprep.subr.bf16.mxu0 %v327_v3  ;;  %v241_v16 = vpack.c.bf16 %v42_v15, %v41_v14  ;;  %v244_v19 = vpack.c.bf16 %v44_v18, %v43_v17  ;;  %v45_v20 = vld [vmem:[%s449_s2 + $0x60] sm:$0xff]  ;;  %v46_v21 = vld [vmem:[%s449_s2 + $0x68] sm:$0xff]  ;;  %v47_v23 = vld [vmem:[%s449_s2 + $0x70] sm:$0xff] }
  0x15   :  { %v247_v22 = vpack.c.bf16 %v46_v21, %v45_v20  ;;  %v48_v24 = vld [vmem:[%s449_s2 + $0x78] sm:$0xff]  ;;  %v49_v26 = vld [vmem:[%s448_s1] sm:$0xff]  ;;  %s330_s1 = smov [#allocation5]  }
  0x16   :  { %v250_v25 = vpack.c.bf16 %v48_v24, %v47_v23  ;;  %s151_s2 = sshll.u32 %s330_s1, 4  ;;  %s152_s2 = int_to_ptr.vmem [resolvable:$true] %s151_s2 }
  0x17   :  { %233 = vmatpush3.bf16.msra.mxu0 %v232_v7  ;;  %v50_v27 = vstv %s32_s21  ;;  %s276_s8 = scalar_lea.vmem %s152_s2, 128  ;;  %p281_p6 = scmp.lt.s32.totalorder %s152_s2, %s152_s2 }
  0x18   :  { %234 = vmatprep.subr.bf16.mxu0 %v327_v3  ;;  %v51_v28 = vmul.f32 %v50_v27, %v49_v26  ;;  %p277_p5 = scmp.ne.s32.totalorder %s152_s2, %s276_s8  ;;  %p282_p7 = scmp.lt.s32.totalorder %s276_s8, %s276_s8 }
  0x1a   :  { %p283_p8 = por %p282_p7, %p281_p6 }
  0x1b   :  { %236 = vmatpush3.bf16.msra.mxu0 %v235_v10 }
  0x1c   :  { %237 = vmatprep.subr.bf16.mxu0 %v327_v3  ;;  %p284_p9 = pnand %p283_p8, %p277_p5 }
  0x1f   :  { %239 = vmatpush3.bf16.msra.mxu0 %v238_v13 }
  0x20   :  { %240 = vmatprep.subr.bf16.mxu0 %v327_v3 }
  0x23   :  { %242 = vmatpush3.bf16.msra.mxu0 %v241_v16 }
  0x24   :  { %243 = vmatprep.subr.bf16.mxu0 %v327_v3 }
  0x27   :  { %245 = vmatpush3.bf16.msra.mxu0 %v244_v19 }
  0x28   :  { %246 = vmatprep.subr.bf16.mxu0 %v327_v3 }
  0x2b   :  { %248 = vmatpush3.bf16.msra.mxu0 %v247_v22 }
  0x2c   :  { %249 = vmatprep.subr.bf16.mxu0 %v327_v3 }
  0x2f   :  { %251 = vmatpush3.bf16.msra.mxu0 %v250_v25 }
  0x32   :  { %226 = vmatmul.mubr.f32.vlgmr.msra.gmra.mrb[0].mxu0 %v51_v28 }
 0x105   :  { %v118_v29 = vpop.f32.mrb[0].mxu0 }
 0x106   :  { %v138_v30 = vsub.f32 %v118_v29, %v118_v29  ;;  %v227_v31 = vpop.f32.mrb[1].mxu0  ;;  %v123_v32 = vsel %vm122_vm1, %v118_v29, -inf  ;;  %137 = vst.msk [vmem:[#allocation5] sm:$0xff] %vm122_vm1, %v118_v29 }
 0x107   :  { %124 = vmax.xlane.f32.xlu0 %v123_v32 }
 0x108   :  { %v139_v33 = vmul.f32 1.442695, %v138_v30 }
 0x10a   :  { %258 = vpow2.f32 %v139_v33 }
 0x114   :  { %v259_v34 = vpop.eup %258 }
 0x115   :  { %142 = vst.msk [vmem:[#allocation6] sm:$0xff] %vm122_vm1, %v259_v34 }
 0x194   :  { %v125_v35 = vpop.xlane.xlu0 %124 }
 0x195   :  { %v126_v36 = vsub.f32 %v118_v29, %v125_v35 }
 0x197   :  { %v127_v37 = vmul.f32 1.442695, %v126_v36 }
 0x199   :  { %260 = vpow2.f32 %v127_v37 }
 0x1a3   :  { %v261_v38 = vpop.eup %260 }
 0x1a4   :  { %v129_v39 = vsel %vm122_vm1, %v261_v38, 0.0 }
 0x1a5   :  { %130 = vadd.xlane.f32.xlu0 %v129_v39 }
 0x1a6   :  { %287 = shalt.err (!%p284_p9)
}
 0x1a7   :  { %s288_s11 = scalar_lea.hbm %s451_s4, 128 }
 0x1a8   :  { %p289_p10 = scmp.ne.s32.totalorder %s451_s4, %s288_s11  ;;  %p292_p11 = scmp.lt.u32.totalorder %s288_s11, %s451_s4 }
 0x1aa   :  { %p294_p12 = pnand %p292_p11, %p289_p10 }
 0x1ac   :  { %297 = shalt.err (!%p294_p12)
}
 0x1ad   :  { %154 = dma.vmem_to_hbm [thread:$0]  %s152_s2, 128, %s451_s4, [#allocation3]  }
 0x1ae   :  { %s298_s18 = scalar_lea.vmem %s162_s7, 128  ;;  %p303_p0 = scmp.lt.s32.totalorder %s162_s7, %s162_s7 }
 0x1af   :  { %p299_p13 = scmp.ne.s32.totalorder %s162_s7, %s298_s18  ;;  %p304_p1 = scmp.lt.s32.totalorder %s298_s18, %s298_s18 }
 0x1b1   :  { %p305_p2 = por %p304_p1, %p303_p0 }
 0x1b3   :  { %p306_p3 = pnand %p305_p2, %p299_p13 }
 0x1b5   :  { %309 = shalt.err (!%p306_p3)
}
 0x1b6   :  { %s310_s21 = scalar_lea.hbm %s452_s5, 128 }
 0x1b7   :  { %p311_p4 = scmp.ne.s32.totalorder %s452_s5, %s310_s21  ;;  %p314_p5 = scmp.lt.u32.totalorder %s310_s21, %s452_s5 }
 0x1b9   :  { %p316_p6 = pnand %p314_p5, %p311_p4 }
 0x1bb   :  { %319 = shalt.err (!%p316_p6)
}
 0x1bc   :  { %164 = dma.vmem_to_hbm [thread:$0]  %s162_s7, 128, %s452_s5, [#allocation7]   ;;  %vm135_vm2 = vcmask 7168  }
 0x232   :  { %v131_v40 = vpop.xlane.xlu0 %130 }
 0x233   :  { %262 = vlog2.f32 %v131_v40 }
 0x23d   :  { %v263_v41 = vpop.eup %262 }
 0x23e   :  { %v133_v42 = vmul.f32 0.6931472, %v263_v41 }
 0x240   :  { %v134_v43 = vadd.f32 %v133_v42, %v125_v35 }
 0x242   :  { %136 = vst.msk [vmem:[%s450_s3] sm:$0xff] %vm135_vm2, %v134_v43 }
 0x243   :  { %322 = dma.done.wait [#allocation3], 128  }
 0x244   :  { %323 = vsyncadd [#allocation3], 4294967168 }
 0x245   :  { %324 = dma.done.wait [#allocation7], 128  }
 0x246   :  { %325 = vsyncadd [#allocation7], 4294967168 }
 0x247   :  { %173 = vsyncpa [#allocation3], 1 }
 0x248   :  { %174 = vsyncpa [#allocation7], 1 }
 0x249   :  { %175 = vsyncpa [#allocation4], 1 }

</bundles_post_ra>
